<compile_context>
chip_gen: v5e
topology: v5e:2x2
jax: 0.10.0
libtpu: 0.0.40
codegen_flags: <defaults>
</compile_context>

<pallas_src>
import jax
import jax.numpy as jnp
from jax.experimental import pallas as pl
from jax.experimental.pallas import tpu as pltpu


def _proj_kernel(x_ref, w_ref, o_ref):
    # x_ref: (TM, K)   w_ref: (K, N)   o_ref: (TM, N);  y = x @ w, f32 accumulate.
    o_ref[...] = jnp.dot(
        x_ref[...], w_ref[...], preferred_element_type=jnp.float32
    ).astype(o_ref.dtype)


def _round_up(v, m):
    return ((v + m - 1) // m) * m


def condition_projection(x, weight, *, max_tile_m=8192, min_m_for_kernel=2048):
    """
    x:      (..., in_dims)   -- any number of leading dims
    weight: (shape, in_dims) -- same convention as nn.Linear.weight
    returns (..., shape)     == x @ weight.T
    """
    in_dims = x.shape[-1]
    out_dims = weight.shape[0]
    assert weight.shape[1] == in_dims

    lead = x.shape[:-1]
    m = 1
    for d in lead:
        m *= d
    x2d = x.reshape(m, in_dims)

    # Small-M fast path: pallas_call dispatch + pipeline setup dwarfs the ~KBs of
    # data movement; let XLA fuse the plain matmul instead.
    if m < min_m_for_kernel:
        return (x2d @ weight.T).reshape(*lead, out_dims)

    # Lane fold: pack f rows into the lane dimension via a block-diagonal weight
    # so the output last dim becomes f*out_dims (=128 for out_dims=32).
    f = max(1, 128 // out_dims)
    if f > 1 and m % f == 0:
        m_rows = m // f
        k_in = f * in_dims
        n_out = f * out_dims
        x_in = x2d.reshape(m_rows, k_in)                       # free row-major view
        w_in = jnp.kron(jnp.eye(f, dtype=weight.dtype), weight.T)  # (f*K, f*N) block-diag
    else:
        # Fallback: unfolded projection; weight pre-transposed once here so the
        # kernel never re-orients it per grid step.
        m_rows, k_in, n_out = m, in_dims, out_dims
        x_in = x2d
        w_in = weight.T

    # Sublane granularity: 8 rows for 32-bit, 16 for packed bf16.
    sub = 16 if x.dtype == jnp.bfloat16 else 8

    # Aim for grid_m >= ~4 (megacore sharding on v7x with >=2 steps per core),
    # capped by max_tile_m for VMEM; always a multiple of the sublane granularity.
    target = max(_round_up(pl.cdiv(m_rows, 4), sub), sub)
    tm = min(_round_up(max_tile_m, sub), target)
    tm = min(tm, _round_up(m_rows, sub))
    if m_rows < sub:
        tm = m_rows  # block == full dim is always legal
    grid_m = pl.cdiv(m_rows, tm)

    x_bytes = jnp.dtype(x.dtype).itemsize
    w_bytes = jnp.dtype(w_in.dtype).itemsize
    cost = pl.CostEstimate(
        flops=2 * m_rows * k_in * n_out,
        transcendentals=0,
        bytes_accessed=(
            x_bytes * m_rows * k_in
            + w_bytes * k_in * n_out
            + x_bytes * m_rows * n_out
        ),
    )

    out = pl.pallas_call(
        _proj_kernel,
        out_shape=jax.ShapeDtypeStruct((m_rows, n_out), x.dtype),
        grid_spec=pltpu.PrefetchScalarGridSpec(
            num_scalar_prefetch=0,
            grid=(grid_m,),
            in_specs=[
                # x: tile over M, full K (K == full last dim, no (8,128) issue)
                pl.BlockSpec((tm, k_in), lambda i: (i, 0)),
                # weight: full array, constant index -> VMEM-resident across grid
                pl.BlockSpec((k_in, n_out), lambda i: (0, 0)),
            ],
            out_specs=pl.BlockSpec((tm, n_out), lambda i: (i, 0)),
        ),
        compiler_params=pltpu.CompilerParams(
            dimension_semantics=("parallel",),
            vmem_limit_bytes=32 * 1024 * 1024,  # clears v5e's 16 MiB scoped default
        ),
        cost_estimate=cost,
    )(x_in, w_in)

    # Folded (M/f, f*N) flattens row-major to exactly the (M, N) row order.
    return out.reshape(*lead, out_dims)


if __name__ == "__main__":
    # Mirrors the docstring example: project last dim 26 -> 32
    # (in_dims=[26], max_mult=4, shape=[32], dims=2).
    in_dims = 26
    out_shape = 32

    key = jax.random.PRNGKey(0)
    kx, kw, kx2, kx3 = jax.random.split(key, 4)

    # nn.Linear(in_dims, shape, bias=False) weight: (shape, in_dims),
    # uniform(-1/sqrt(in_dims), 1/sqrt(in_dims)) init.
    bound = 1.0 / (in_dims ** 0.5)
    weight = jax.random.uniform(
        kw, (out_shape, in_dims), dtype=jnp.float32, minval=-bound, maxval=bound
    )

    # (1) Small shape from the module spec: (2, 16, 26) -> (2, 16, 32).
    #     Takes the plain-XLA fast path by default (M=32 is tiny).
    x_small = jax.random.normal(kx, (2, 16, in_dims), dtype=jnp.float32)
    y_small = jax.block_until_ready(condition_projection(x_small, weight))
    assert y_small.shape == (2, 16, out_shape)
    assert jnp.allclose(y_small, x_small @ weight.T, atol=1e-5, rtol=1e-5)

    # (2) Same input, kernel forced: exercises the lane-folded Pallas path
    #     (M=32 is divisible by the fold factor 4).
    y_forced = jax.block_until_ready(
        condition_projection(x_small, weight, min_m_for_kernel=0)
    )
    assert jnp.allclose(y_forced, x_small @ weight.T, atol=1e-5, rtol=1e-5)

    # (3) Medium input: default path uses the folded kernel with a multi-step grid.
    x_med = jax.random.normal(kx2, (4, 1024, in_dims), dtype=jnp.float32)
    y_med = jax.block_until_ready(condition_projection(x_med, weight))
    assert y_med.shape == (4, 1024, out_shape)
    assert jnp.allclose(y_med, x_med @ weight.T, atol=1e-5, rtol=1e-5)

    # (4) Flattened M not divisible by the fold factor: exercises the unfolded
    #     fallback kernel path (same kernel body).
    x_odd = jax.random.normal(kx3, (3, 17, in_dims), dtype=jnp.float32)
    y_odd = jax.block_until_ready(
        condition_projection(x_odd, weight, min_m_for_kernel=0)
    )
    assert y_odd.shape == (3, 17, out_shape)
    assert jnp.allclose(y_odd, x_odd @ weight.T, atol=1e-5, rtol=1e-5)

    print("KERNEL_OK")
</pallas_src>

<mosaic_0001>
module attributes {stable_mosaic.version = 11 : i64} {
  func.func @_proj_kernel(%arg0: i32, %arg1: memref<8x104xf32, #tpu.memory_space<vmem>>, %arg2: memref<104x128xf32, #tpu.memory_space<vmem>>, %arg3: memref<8x128xf32, #tpu.memory_space<vmem>>) attributes {dimension_semantics = [#tpu.dimension_semantics<parallel>], iteration_bounds = array<i64: 1>, scalar_prefetch = 0 : i64, scratch_operands = 0 : i64, tpu.core_type = #tpu.core_type<tc>, window_params = [{transform_indices = @transform_0, window_bounds = array<i64: 8, 104>}, {pipeline_mode = #tpu.pipeline_mode<synchronous>, transform_indices = @transform_1, window_bounds = array<i64: 104, 128>}, {transform_indices = @transform_2, window_bounds = array<i64: 8, 128>}]} {
    %c0 = arith.constant 0 : index
    %c0_0 = arith.constant 0 : index
    %0 = vector.load %arg1[%c0, %c0_0] : memref<8x104xf32, #tpu.memory_space<vmem>>, vector<8x104xf32>
    %c0_1 = arith.constant 0 : index
    %c0_2 = arith.constant 0 : index
    %1 = vector.load %arg2[%c0_1, %c0_2] : memref<104x128xf32, #tpu.memory_space<vmem>>, vector<104x128xf32>
    %cst = arith.constant dense<0.000000e+00> : vector<8x128xf32>
    %2 = tpu.matmul %0, %1, %cst {dimension_numbers = #tpu.dot_dimension_numbers<[1], [0], [0], [1], [0, 0, 1, 1], [], []>} : vector<8x104xf32>, vector<104x128xf32>, vector<8x128xf32> -> vector<8x128xf32>
    %c0_3 = arith.constant 0 : index
    %c0_4 = arith.constant 0 : index
    %3 = vector.load %arg3[%c0_3, %c0_4] : memref<8x128xf32, #tpu.memory_space<vmem>>, vector<8x128xf32>
    tpu.vector_store %arg3[%c0_3, %c0_4], %2 {strides = array<i32>} : memref<8x128xf32, #tpu.memory_space<vmem>>, vector<8x128xf32>,
    return
  }
  func.func @transform_0(%arg0: i32) -> (i32, i32) {
    %c0_i32 = arith.constant 0 : i32
    %c0_i32_0 = arith.constant 0 : i32
    return %arg0, %c0_i32 : i32, i32
  }
  func.func @transform_1(%arg0: i32) -> (i32, i32) {
    %c0_i32 = arith.constant 0 : i32
    %c0_i32_0 = arith.constant 0 : i32
    %c0_i32_1 = arith.constant 0 : i32
    return %c0_i32, %c0_i32_0 : i32, i32
  }
  func.func @transform_2(%arg0: i32) -> (i32, i32) {
    %c0_i32 = arith.constant 0 : i32
    %c0_i32_0 = arith.constant 0 : i32
    return %arg0, %c0_i32 : i32, i32
  }
}

</mosaic_0001>

<bundles_post_ra>
// kernel: tpu_custom_call.1
= control target key start
LH: loop header
LB: loop body
LE: loop exit
PB: predicated region body
PF: predicated region fallthrough
CT: control target
= control target key end

     0   :  { %7 = vsyncpa [#allocation3], 0  ;;  %s212_s0 = inlined_call_operand.hbm [shape: f32[8,104], index: 0, kind: input, shape index: {}]   ;;  %s213_s1 = inlined_call_operand.hbm [shape: f32[104,128], index: 1, kind: input, shape index: {}]   ;;  %s214_s2 = inlined_call_operand.hbm [shape: f32[8,128], index: 2, kind: output, shape index: {}]  }
   0x1   :  { %8 = vsyncpa [#allocation6], 0 }
   0x2   :  { %9 = vsyncpa [#allocation4], 0  ;;  %s15_s11 = sshll.u32 %s212_s0, 4  ;;  %s183_s12 = smov [#allocation2]   ;;  %s16_s11 = int_to_ptr.hbm [resolvable:$true] %s15_s11 }
   0x3   :  { %s17_s13 = sshll.u32 %s183_s12, 4  ;;  %s25_s16 = sshll.u32 %s213_s1, 4  ;;  %s18_s13 = int_to_ptr.vmem [resolvable:$true] %s17_s13  ;;  %s26_s16 = int_to_ptr.hbm [resolvable:$true] %s25_s16 }
   0x4   :  { %20 = dma.hbm_to_vmem [thread:$0]  %s16_s11, 128, %s18_s13, [#allocation3]  }
   0x5   :  { %s184_s17 = smov [#allocation5]   ;;  %s185_s19 = smov 128  }
   0x6   :  { %s27_s18 = sshll.u32 %s184_s17, 4  ;;  %s186_s20 = smov 8   ;;  %s28_s18 = int_to_ptr.vmem [resolvable:$true] %s27_s18 }
   0x7   :  { %33 = dma.hbm_to_vmem [thread:$0]  %s26_s16, 1664, %s28_s18, [#allocation6], %s185_s19, %s185_s19, %s186_s20  }
   0x8   :  { %177 = dma.done.wait [#allocation3], 128  }
   0x9   :  { %178 = vsyncadd [#allocation3], 4294967168 }
   0xa   :  { %179 = dma.done.wait [#allocation6], 1664  }
   0xb   :  { %180 = vsyncadd [#allocation6], 4294965632  ;;  %v55_v0 = vld [vmem:[#allocation5 + $0x60] sm:$0xff]  ;;  %v54_v1 = vld [vmem:[#allocation5 + $0x58] sm:$0xff]  ;;  %vm56_vm0 = vcmask 850944   ;;  %s187_s0 = smov [#allocation7]  }
   0xc   :  { %63 = vmatpush.msra.mxu0 %v55_v0  ;;  %v53_v2 = vld [vmem:[#allocation5 + $0x50] sm:$0xff]  ;;  %v52_v3 = vld [vmem:[#allocation5 + $0x48] sm:$0xff]  ;;  %v51_v4 = vld [vmem:[#allocation5 + $0x40] sm:$0xff]  ;;  %s86_s1 = sshll.u32 %s187_s0, 4  ;;  %s88_s23 = sshll.u32 %s214_s2, 4  ;;  %s87_s1 = int_to_ptr.vmem [resolvable:$true] %s86_s1  ;;  %s89_s23 = int_to_ptr.hbm [resolvable:$true] %s88_s23 }
   0xd   :  { %v50_v5 = vld [vmem:[#allocation5 + $0x38] sm:$0xff]  ;;  %v49_v6 = vld [vmem:[#allocation5 + $0x30] sm:$0xff]  ;;  %v48_v7 = vld [vmem:[#allocation5 + $0x28] sm:$0xff] }
   0xe   :  { %64 = vmatpush.msra.mxu0 %v54_v1  ;;  %v47_v8 = vld [vmem:[#allocation5 + $0x20] sm:$0xff]  ;;  %v46_v9 = vld [vmem:[#allocation5 + $0x18] sm:$0xff]  ;;  %v45_v10 = vld [vmem:[#allocation5 + $0x10] sm:$0xff] }
   0xf   :  { %v44_v11 = vld [vmem:[#allocation5 + $0x8] sm:$0xff]  ;;  %v43_v12 = vld [vmem:[#allocation5] sm:$0xff]  ;;  %v42_v13 = vld [vmem:[#allocation2] sm:$0xff] }
  0x10   :  { %65 = vmatpush.msra.mxu0 %v53_v2 }
  0x12   :  { %66 = vmatpush.msra.mxu0 %v52_v3 }
  0x14   :  { %67 = vmatpush.msra.mxu0 %v51_v4 }
  0x16   :  { %68 = vmatpush.msra.mxu0 %v50_v5 }
  0x18   :  { %69 = vmatpush.msra.mxu0 %v49_v6 }
  0x1a   :  { %70 = vmatpush.msra.mxu0 %v48_v7 }
  0x1c   :  { %71 = vmatpush.msra.mxu0 %v47_v8 }
  0x1e   :  { %72 = vmatpush.msra.mxu0 %v46_v9 }
  0x20   :  { %73 = vmatpush.msra.mxu0 %v45_v10 }
  0x22   :  { %74 = vmatpush.msra.mxu0 %v44_v11 }
  0x24   :  { %75 = vmatpush.msra.mxu0 %v43_v12 }
  0x25   :  { %99 = vmatmul.msk.f32.vlgmr.msra.gmra.mxu0 %vm56_vm0, %v42_v13 }
  0xa2   :  { %v77_v14 = vpop.f32.mrf.mxu0 }
  0xa3   :  { %80 = vst [vmem:[#allocation7] sm:$0xff] %v77_v14 }
  0xa4   :  { %91 = dma.vmem_to_hbm [thread:$0]  %s87_s1, 128, %s89_s23, [#allocation4]  }
  0xa5   :  { %181 = dma.done.wait [#allocation4], 128  }
  0xa6   :  { %182 = vsyncadd [#allocation4], 4294967168 }
  0xa7   :  { %96 = vsyncpa [#allocation3], 1 }
  0xa8   :  { %97 = vsyncpa [#allocation6], 1 }
  0xa9   :  { %98 = vsyncpa [#allocation4], 1 }

</bundles_post_ra>
